<compile_context>
chip_gen: v7x
topology: tpu7x:2x2x1
jax: 0.10.0
libtpu: 0.0.40
codegen_flags: <defaults>
</compile_context>

<pallas_src>
import jax
import jax.numpy as jnp
from jax import lax
from jax.experimental import pallas as pl
from jax.experimental.pallas import tpu as pltpu

_LANE = 128
_MAX_TB = 8192  # per-step tile cap (rows); keeps per-step DMA ~4 MiB at DeepAR shapes


def _gaussian_kernel(w_ref, b_ref, ht_ref, out_ref):
    # w_ref:   [2*O, H]   fused (mu | sigma) weights, PyTorch nn.Linear layout, resident
    # b_ref:   [2*O, 1]   fused bias, resident
    # ht_ref:  [H, TB]    h transposed -- batch on lanes (streamed per grid step)
    # out_ref: [2*O, TB]  rows [0:O] = mu, rows [O:2O] = sigma   (lane-dense store)
    y = jnp.dot(w_ref[...], ht_ref[...], preferred_element_type=jnp.float32)
    y = y + b_ref[...].astype(jnp.float32)  # broadcast bias across the lane (batch) axis

    o = out_ref.shape[0] // 2
    eps = jnp.float32(1e-6)

    if o % 8 == 0:
        # Sigma rows form a sublane-aligned slice: run the transcendentals only
        # on the half that needs them and do two aligned stores (no concat).
        mu = y[:o]
        s = y[o:]
        # Numerically stable softplus: max(s,0) + log1p(exp(-|s|)) (no overflow
        # for large logits, unlike the naive log(1+exp(s))).
        sigma = jnp.maximum(s, 0.0) + jnp.log1p(jnp.exp(-jnp.abs(s))) + eps
        out_ref[:o, :] = mu.astype(out_ref.dtype)
        out_ref[o:, :] = sigma.astype(out_ref.dtype)
    else:
        # Fallback for unaligned O: compute softplus everywhere, row-select.
        sp = jnp.maximum(y, 0.0) + jnp.log1p(jnp.exp(-jnp.abs(y))) + eps
        row = lax.broadcasted_iota(jnp.int32, y.shape, 0)
        out_ref[...] = jnp.where(row < o, y, sp).astype(out_ref.dtype)


def prepare_gaussian_params(w_mu, b_mu, w_sigma, b_sigma):
    """One-time parameter prep (hoisted out of the per-call forward).

    w_mu, w_sigma: [O, H]  (PyTorch nn.Linear .weight layout: [out, in])
    b_mu, b_sigma: [O]
    Returns (w_fused [2*O, H], b_fused [2*O, 1]) in float32.
    """
    w = jnp.concatenate([w_mu, w_sigma], axis=0).astype(jnp.float32)            # [2O, H]
    b = jnp.concatenate([b_mu, b_sigma], axis=0).astype(jnp.float32)[:, None]    # [2O, 1]
    return w, b


def _default_vmem_budget_bytes():
    # Per-generation budget for the double-buffered streamed tiles. Capped at
    # 12 MiB so it also fits v5e's 16 MiB default scoped-VMEM limit with
    # headroom for the resident weights and compiler scratch; on v7x (64 MiB
    # physical) capacity // 8 = 8 MiB keeps us well clear of its smaller VMEM.
    try:
        return min(pltpu.get_tpu_info().vmem_capacity_bytes // 8, 12 * 1024 * 1024)
    except Exception:
        return 12 * 1024 * 1024


def _pick_batch_tile(B, H, two_o, h_itemsize, tb, vmem_budget_bytes):
    if tb is None:
        budget = _default_vmem_budget_bytes() if vmem_budget_bytes is None else vmem_budget_bytes
        # Double-buffered h^T tile (read) + output tile (write) per row of batch.
        bytes_per_row = 2 * (H * h_itemsize + two_o * 4)
        tb = max(_LANE, min(_MAX_TB, (budget // bytes_per_row) // _LANE * _LANE))
        # Guarantee >= 2 grid tiles when the batch allows it so the "parallel"
        # grid axis can shard across both TensorCores on v7x.
        if B >= 2 * _LANE:
            half = (B + 1) // 2
            half_aligned = ((half + _LANE - 1) // _LANE) * _LANE
            tb = min(tb, half_aligned)
    if tb >= B:
        return B                                   # full extent: always a legal block
    tb = max(_LANE, (tb // _LANE) * _LANE)         # lane-aligned when tiling the batch
    return B if tb >= B else tb


def gaussian_forward(h, w_fused, b_fused, *, tb=None, vmem_budget_bytes=None):
    """Gaussian head forward.

    h:        [B, H]   (B = batch [* time] rows, H = hidden)
    w_fused:  [2*O, H] from prepare_gaussian_params
    b_fused:  [2*O, 1]
    Returns (mu, sigma): mu [B, O] in h.dtype, sigma [B, O] in float32
    (float32 so the +1e-6 floor survives; matches torch semantics for f32).
    Both are squeezed to [O] when B == 1, matching .squeeze(0).
    """
    B, H = h.shape
    two_o = w_fused.shape[0]
    O = two_o // 2

    tb = _pick_batch_tile(B, H, two_o, jnp.dtype(h.dtype).itemsize, tb, vmem_budget_bytes)
    grid = (pl.cdiv(B, tb),)

    # Layout plumbing: present the batch axis on lanes for lane-dense DMA.
    ht = h.T  # [H, B]

    out = pl.pallas_call(
        _gaussian_kernel,
        grid=grid,
        in_specs=[
            pl.BlockSpec((two_o, H), lambda i: (0, 0)),   # fused W, resident across grid
            pl.BlockSpec((two_o, 1), lambda i: (0, 0)),   # fused b, resident
            pl.BlockSpec((H, tb), lambda i: (0, i)),      # h^T tile, pipelined over batch
        ],
        out_specs=pl.BlockSpec((two_o, tb), lambda i: (0, i)),
        out_shape=jax.ShapeDtypeStruct((two_o, B), jnp.float32),
        compiler_params=pltpu.CompilerParams(
            dimension_semantics=("parallel",),
        ),
    )(w_fused, b_fused, ht)

    mu = out[:O, :].T.astype(h.dtype)
    sigma = out[O:, :].T  # keep float32 so sigma > 0 is preserved even for bf16 h

    # PyTorch does .squeeze(0): only collapses when B == 1.
    if B == 1:
        mu, sigma = mu[0], sigma[0]
    return mu, sigma


if __name__ == "__main__":
    # Small DeepAR-ish head shapes; B = 256 exercises a 2-tile batch grid.
    B, HIDDEN, OUT = 256, 32, 16

    key = jax.random.PRNGKey(0)
    k_h, k_wm, k_bm, k_ws, k_bs = jax.random.split(key, 5)

    h = jax.random.normal(k_h, (B, HIDDEN), dtype=jnp.float32)
    # PyTorch nn.Linear parameter layout: weight [O, H], bias [O].
    w_mu = jax.random.normal(k_wm, (OUT, HIDDEN), dtype=jnp.float32) * 0.1
    b_mu = jax.random.normal(k_bm, (OUT,), dtype=jnp.float32) * 0.1
    w_sigma = jax.random.normal(k_ws, (OUT, HIDDEN), dtype=jnp.float32) * 0.1
    b_sigma = jax.random.normal(k_bs, (OUT,), dtype=jnp.float32) * 0.1

    # One-time parameter prep (fusion hoisted out of the per-step forward).
    w_fused, b_fused = prepare_gaussian_params(w_mu, b_mu, w_sigma, b_sigma)

    fwd = jax.jit(gaussian_forward)
    mu, sigma = fwd(h, w_fused, b_fused)
    jax.block_until_ready((mu, sigma))

    # Plain-JAX reference (moderate logits -> naive softplus is fine here).
    mu_ref = h @ w_mu.T + b_mu
    sigma_ref = jnp.log1p(jnp.exp(h @ w_sigma.T + b_sigma)) + 1e-6
    assert mu.shape == (B, OUT) and sigma.shape == (B, OUT)
    assert jnp.allclose(mu, mu_ref, atol=1e-5), "mu mismatch"
    assert jnp.allclose(sigma, sigma_ref, atol=1e-5), "sigma mismatch"
    assert bool(jnp.all(sigma > 0.0))

    # Exercise the B == 1 .squeeze(0) path.
    mu1, sigma1 = gaussian_forward(h[:1], w_fused, b_fused)
    jax.block_until_ready((mu1, sigma1))
    assert mu1.shape == (OUT,) and sigma1.shape == (OUT,)
    assert jnp.allclose(mu1, mu_ref[0], atol=1e-5)
    assert jnp.allclose(sigma1, sigma_ref[0], atol=1e-5)

    print("KERNEL_OK")
</pallas_src>

<mosaic_0001>
module attributes {stable_mosaic.version = 11 : i64} {
  func.func @_gaussian_kernel(%arg0: i32, %arg1: memref<32x32xf32, #tpu.memory_space<vmem>>, %arg2: memref<32x1xf32, #tpu.memory_space<vmem>>, %arg3: memref<32x128xf32, #tpu.memory_space<vmem>>, %arg4: memref<32x128xf32, #tpu.memory_space<vmem>>) attributes {dimension_semantics = [#tpu.dimension_semantics<parallel>], iteration_bounds = array<i64: 2>, scalar_prefetch = 0 : i64, scratch_operands = 0 : i64, tpu.core_type = #tpu.core_type<tc>, window_params = [{pipeline_mode = #tpu.pipeline_mode<synchronous>, transform_indices = @transform_0, window_bounds = array<i64: 32, 32>}, {pipeline_mode = #tpu.pipeline_mode<synchronous>, transform_indices = @transform_1, window_bounds = array<i64: 32, 1>}, {transform_indices = @transform_2, window_bounds = array<i64: 32, 128>}, {transform_indices = @transform_3, window_bounds = array<i64: 32, 128>}]} {
    %c0 = arith.constant 0 : index
    %c0_0 = arith.constant 0 : index
    %0 = vector.load %arg1[%c0, %c0_0] : memref<32x32xf32, #tpu.memory_space<vmem>>, vector<32x32xf32>
    %c0_1 = arith.constant 0 : index
    %c0_2 = arith.constant 0 : index
    %1 = vector.load %arg3[%c0_1, %c0_2] : memref<32x128xf32, #tpu.memory_space<vmem>>, vector<32x128xf32>
    %cst = arith.constant dense<0.000000e+00> : vector<32x128xf32>
    %2 = tpu.matmul %0, %1, %cst {dimension_numbers = #tpu.dot_dimension_numbers<[1], [0], [0], [1], [0, 0, 1, 1], [], []>} : vector<32x32xf32>, vector<32x128xf32>, vector<32x128xf32> -> vector<32x128xf32>
    %c0_3 = arith.constant 0 : index
    %c0_4 = arith.constant 0 : index
    %3 = vector.load %arg2[%c0_3, %c0_4] : memref<32x1xf32, #tpu.memory_space<vmem>>, vector<32x1xf32>
    %4 = vector.broadcast %3 : vector<32x1xf32> to vector<32x128xf32>
    %5 = arith.addf %2, %4 : vector<32x128xf32>
    %6 = vector.extract_strided_slice %5 {offsets = [0, 0], sizes = [16, 128], strides = [1, 1]} : vector<32x128xf32> to vector<16x128xf32>
    %7 = vector.extract_strided_slice %5 {offsets = [16, 0], sizes = [16, 128], strides = [1, 1]} : vector<32x128xf32> to vector<16x128xf32>
    %cst_5 = arith.constant 0.000000e+00 : f32
    %8 = vector.broadcast %cst_5 : f32 to vector<16x128xf32>
    %9 = arith.maximumf %7, %8 : vector<16x128xf32>
    %10 = math.absf %7 : vector<16x128xf32>
    %cst_6 = arith.constant 0.000000e+00 : f32
    %11 = vector.broadcast %cst_6 : f32 to vector<16x128xf32>
    %12 = arith.subf %11, %10 : vector<16x128xf32>
    %13 = math.exp %12 : vector<16x128xf32>
    %14 = math.log1p %13 : vector<16x128xf32>
    %15 = arith.addf %9, %14 : vector<16x128xf32>
    %cst_7 = arith.constant 9.99999997E-7 : f32
    %16 = vector.broadcast %cst_7 : f32 to vector<16x128xf32>
    %17 = arith.addf %15, %16 : vector<16x128xf32>
    %c0_8 = arith.constant 0 : index
    %c0_9 = arith.constant 0 : index
    %18 = vector.load %arg4[%c0_8, %c0_9] : memref<32x128xf32, #tpu.memory_space<vmem>>, vector<16x128xf32>
    tpu.vector_store %arg4[%c0_8, %c0_9], %6 {strides = array<i32>} : memref<32x128xf32, #tpu.memory_space<vmem>>, vector<16x128xf32>,
    %c16 = arith.constant 16 : index
    %c0_10 = arith.constant 0 : index
    %19 = vector.load %arg4[%c16, %c0_10] : memref<32x128xf32, #tpu.memory_space<vmem>>, vector<16x128xf32>
    tpu.vector_store %arg4[%c16, %c0_10], %17 {strides = array<i32>} : memref<32x128xf32, #tpu.memory_space<vmem>>, vector<16x128xf32>,
    return
  }
  func.func @transform_0(%arg0: i32) -> (i32, i32) {
    %c0_i32 = arith.constant 0 : i32
    %c0_i32_0 = arith.constant 0 : i32
    %c0_i32_1 = arith.constant 0 : i32
    return %c0_i32, %c0_i32_0 : i32, i32
  }
  func.func @transform_1(%arg0: i32) -> (i32, i32) {
    %c0_i32 = arith.constant 0 : i32
    %c0_i32_0 = arith.constant 0 : i32
    %c0_i32_1 = arith.constant 0 : i32
    return %c0_i32, %c0_i32_0 : i32, i32
  }
  func.func @transform_2(%arg0: i32) -> (i32, i32) {
    %c0_i32 = arith.constant 0 : i32
    %c0_i32_0 = arith.constant 0 : i32
    return %c0_i32, %arg0 : i32, i32
  }
  func.func @transform_3(%arg0: i32) -> (i32, i32) {
    %c0_i32 = arith.constant 0 : i32
    %c0_i32_0 = arith.constant 0 : i32
    return %c0_i32, %arg0 : i32, i32
  }
}

</mosaic_0001>

<bundles_post_ra>
// kernel: gaussian_forward.1
= control target key start
LH: loop header
LB: loop body
LE: loop exit
PB: predicated region body
PF: predicated region fallthrough
CT: control target
= control target key end

     0   :  { %8 = vsyncpa [#allocation3], 0  ;;  %s819_s0 = inlined_call_operand.vmem [shape: f32[32,32], index: 0, kind: input, shape index: {}]   ;;  %s820_s1 = inlined_call_operand.vmem [shape: f32[32,1], index: 1, kind: input, shape index: {}]   ;;  %s821_s2 = inlined_call_operand.hbm [shape: f32[32,256], index: 2, kind: input, shape index: {}]   ;;  %s822_s3 = inlined_call_operand.vmem [shape: f32[32,256], index: 3, kind: output, shape index: {}]  }
   0x1   :  { %10 = vsyncpa [#allocation3 + $0x1], 0  ;;  %s659_s12 = smov 0   ;;  %s661_s13 = smov 0  }
   0x2   :  { %s663_s14 = smov 0   ;;  %s665_s15 = smov 0  }
   0x3 LB: > { %s678_s16 = sadd.s32 4294967295, %s632_s15   ;;  %s681_s17 = sadd.s32 1, %s632_s15   ;;  %s632_s15 = sphi %s665_s15, %s831_s15   ;;  %s628_s14 = sphi %s663_s14, %s830_s14   ;;  %s624_s13 = sphi %s661_s13, %s829_s13   ;;  %s620_s12 = sphi %s659_s12, %s828_s12  }
   0x4   : > { %s62_s18 = ssub.s32 %s632_s15, %s681_s17  ;;  %s65_s19 = sadd.s32 1, %s628_s14 }
   0x5   : > { %p63_p0 = scmp.eq.s32.totalorder %s62_s18, 0  ;;  %p72_p1 = scmp.ne.s32.totalorder %s628_s14, %s624_s13 }
   0x6   : > { %p73_p2 = scmp.eq.s32.totalorder %s632_s15, 0  ;;  %p78_p3 = scmp.ne.s32.totalorder %s624_s13, %s620_s12 }
   0x7   : > { %s691_s20 = scalar_select %p63_p0, %s628_s14, %s65_s19  }
   0x8   : > { %p693_p4 = por %p73_p2, %p72_p1  ;;  %p79_p5 = scmp.eq.s32.totalorder %s678_s16, 0 }
   0x9   : > { %p102_p6 = scmp.eq.s32.totalorder %s678_s16, 1  ;;  %p521_p8 = scmp.lt.s32.totalorder %s632_s15, 2 }
   0xa   : > { %p699_p7 = por %p79_p5, %p78_p3  ;;  %s134_s24 = sand.u32 1, %s628_s14  }
   0xb   : > { %p704_p9 = por %p102_p6, %p72_p1  ;;  %s468_s25 = sshll.u32 %s134_s24, 5 }
   0xc   : > { %s469_s26 = sshll.u32 %s632_s15, 7  ;;  %s138_s30 = scalar_lea.vmem [#allocation2], %s468_s25 }
   0xd   : > { %s825_s23 = scalar_select %p704_p9, 1, 0 }
   0xe   : > { %s713_s29 = scalar_lea.hbm %s821_s2, %s469_s26  ;;  %s144_s4 = sshll.u32 %s138_s30, 4  ;;  %s715_s4 = int_to_ptr.vmem [resolvable:$true] %s144_s4 }
   0xf   : > { %p719_p10 = pnand %p521_p8, %p693_p4  ;;  %s723_s6 = scalar_lea.sflag [#allocation3], %s134_s24 }
  0x10   : > { %s568_s7 = scalar_lea.hbm %s713_s29, 512  ;;  %s573_s10 = scalar_lea.hbm %s821_s2, 1024 }
  0x11   : > { %p569_p11 = scmp.ne.s32.totalorder %s713_s29, %s568_s7  ;;  %p570_p12 = pneg %p719_p10 }
  0x12   : > { %p574_p1 = scmp.lt.u32.totalorder %s713_s29, %s821_s2  ;;  %p575_p2 = scmp.lt.u32.totalorder %s573_s10, %s568_s7 }
  0x13   : > { %p571_p13 = pnand %p570_p12, %p569_p11  ;;  %p577_p4 = scmp.lt.u32.totalorder %s568_s7, %s713_s29 }
  0x14   : > { %p576_p3 = por %p575_p2, %p574_p1 }
  0x15   : > { %p572_p0 = pneg %p571_p13 }
  0x16   : > { %p578_p5 = por %p577_p4, %p576_p3 }
  0x18   : > { %p579_p6 = pnand %p578_p5, %p572_p0 }
  0x1a   : > { %582 = shalt.err (!%p579_p6)
}
  0x1b   : > { %s583_s18 = scalar_lea.vmem %s715_s4, 512  ;;  %s634_s19 = smov [#allocation2]  }
  0x1c   : > { %p584_p8 = scmp.ne.s32.totalorder %s715_s4, %s583_s18  ;;  %s588_s21 = sshll.u32 %s634_s19, 4  ;;  %s589_s21 = int_to_ptr.vmem [resolvable:$false] %s588_s21 }
  0x1d   : > { %s590_s24 = scalar_lea.vmem %s589_s21, 1024  ;;  %p591_p9 = scmp.lt.s32.totalorder %s715_s4, %s589_s21 }
  0x1e   : > { %p586_p11 = pnand %p584_p8, %p570_p12  ;;  %p592_p1 = scmp.lt.s32.totalorder %s590_s24, %s583_s18 }
  0x20   : > { %p587_p13 = pneg %p586_p11  ;;  %p593_p2 = por %p592_p1, %p591_p9 }
  0x22   : > { %p594_p3 = pnand %p593_p2, %p587_p13 }
  0x24   : > { %597 = shalt.err (!%p594_p3)
}
  0x25   : > { %s635_s25 = smov 256   ;;  %s636_s26 = smov 128  }
  0x26   : > { %s637_s27 = smov 8   ;;  %p470_p12 = scmp.ge.s32.totalorder %s632_s15, 1 }
  0x27   : > { %520 = dma.hbm_to_vmem [thread:$0]  (!%p719_p10), %s713_s29, 512, %s715_s4, %s723_s6, %s635_s25, %s636_s26, %s637_s27  }
  0x28   : > { %p152_p0 = scmp.lt.s32.totalorder %s632_s15, 3 }
  0x2a   : > { %p153_p4 = pnand %p470_p12, %p152_p0 }
  0x2b   : > { %s158_s28 = sand.u32 (!%p153_p4), 1, %s624_s13  }
  0x2c   : > { %156 = sbr.rel (%p153_p4) target bundleno = 324 (0x144), region = 32  ;;  %s754_s30 = sshll.u32 (!%p153_p4), %s158_s28, 5 }
  0x2d   : > { %s159_s7 = scalar_lea.sflag (!%p153_p4), [#allocation3], %s158_s28  ;;  %s162_s8 = scalar_lea.vmem (!%p153_p4), [#allocation2], %s754_s30 }
  0x33   : > { %615 = dma.done.wait (%p699_p7), %s159_s7, 512  }
  0x34   : > { %617 = vsyncadd (%p699_p7), %s159_s7, 4294966784  ;;  %v638_v0 = vmov 0   ;;  %vm216_vm0 = vcmask 261120   ;;  %v188_v1 = vld [vmem:[%s162_s8] sm:$0xff]  ;;  %v189_v2 = vld [vmem:[%s162_s8 + $0x8] sm:$0xff]  ;;  %s790_s27 = scalar_lea.vmem [#allocation4], %s754_s30 }
  0x35   : > { %558 = vset.pattern.permute.xlu0 %v638_v0  ;;  %559 = vset.pattern.permute.xlu1 %v638_v0  ;;  %v190_v3 = vld [vmem:[%s162_s8 + $0x10] sm:$0xff]  ;;  %v503_v4 = vpack.c.bf16 %v189_v2, %v188_v1  ;;  %v191_v5 = vld [vmem:[%s162_s8 + $0x18] sm:$0xff]  ;;  %v184_v8 = vld [vmem:[%s819_s0] sm:$0xff]  ;;  %p827_p7 = scmp.ne.s32.totalorder %s825_s23, 0 }
  0x36   : > { %v186_v6 = vld [vmem:[%s819_s0 + $0x10] sm:$0xff]  ;;  %v507_v7 = vpack.c.bf16 %v191_v5, %v190_v3  ;;  %v192_v10 = vld [vmem:[%s820_s1] sm:$0xff]  ;;  %497 = vmatprep.mubr.msk.f32.mxu0 %vm216_vm0, %v184_v8  ;;  %v195_v11 = vld [vmem:[%s820_s1 + $0x18] sm:$0xff]  ;;  %s478_s28 = sshll.u32 (%p827_p7), %s678_s16, 3 }
  0x37   : > { %500 = vmatprep.mubr.msk.f32.mxu1 %vm216_vm0, %v186_v6  ;;  %511 = vmatprep.subr.bf16.mxu1 %v503_v4  ;;  %v194_v9 = vld [vmem:[%s820_s1 + $0x10] sm:$0xff]  ;;  %v187_v12 = vld [vmem:[%s819_s0 + $0x18] sm:$0xff]  ;;  %v185_v13 = vld [vmem:[%s819_s0 + $0x8] sm:$0xff]  ;;  %s358_s8 = scalar_lea.vmem (%p827_p7), %s822_s3, %s478_s28 }
  0x38   : > { %504 = vmatprep.subr.bf16.mxu0 %v503_v4  ;;  %513 = vmatpush3.bf16.msra.mxu1 %v503_v4  ;;  %v193_v14 = vld [vmem:[%s820_s1 + $0x8] sm:$0xff] }
  0x39   : > { %506 = vmatpush3.bf16.msra.mxu0 %v503_v4  ;;  %512 = vmatprep.subr.bf16.mxu1 %v507_v7 }
  0x3a   : > { %508 = vmatprep.subr.bf16.mxu0 %v507_v7  ;;  %208 = vperm.xlu0 %558, %v194_v9  }
  0x3b   : > { %198 = vperm.xlu1 %559, %v192_v10  }
  0x3c   : > { %514 = vmatpush3.bf16.msra.mxu1 %v507_v7 }
  0x3d   : > { %510 = vmatpush3.bf16.msra.mxu0 %v507_v7 }
  0x3e   : > { %213 = vperm.xlu0 %558, %v195_v11  }
  0x3f   : > { %501 = vmatmul.mubr.msk.f32.vlgmr.msra.gmra.mrb[0].mxu1 %vm216_vm0, %v187_v12  ;;  %203 = vperm.xlu1 %559, %v193_v14  }
  0x40   : > { %498 = vmatmul.mubr.msk.f32.vlgmr.msra.gmra.mrb[0].mxu0 %vm216_vm0, %v185_v13 }
  0xb9   : > { %v209_v16 = vpop.permute.xlu0 %208 }
  0xba   : > { %v199_v15 = vpop.permute.xlu1 %198 }
  0xbd   : > { %v214_v18 = vpop.permute.xlu0 %213 }
  0xbe   : > { %v204_v17 = vpop.permute.xlu1 %203 }
 0x112   : > { %v502_v19 = vpop.f32.mrb[0].mxu1 }
 0x113   : > { %v499_v20 = vpop.f32.mrb[0].mxu0  ;;  %v311_v21 = vadd.f32 %v502_v19, %v214_v18  ;;  %v305_v22 = vpop.f32.mrb[1].mxu1 }
 0x114   : > { %v301_v23 = vadd.f32 %v499_v20, %v204_v17  ;;  %v295_v24 = vpop.f32.mrb[1].mxu0  ;;  %v306_v25 = vadd.f32 %v305_v22, %v209_v16 }
 0x115   : > { %v296_v26 = vadd.f32 %v295_v24, %v199_v15  ;;  %v317_v27 = vand.u32 2147483647, %v311_v21  ;;  %v315_v47 = vmax.f32 %v311_v21, 0.0 }
 0x116   : > { %347 = vst [vmem:[%s790_s27 + $0x8] sm:$0xff] %v301_v23  ;;  %v316_v28 = vand.u32 2147483647, %v306_v25  ;;  %v314_v51 = vmax.f32 %v306_v25, 0.0 }
 0x117   : > { %346 = vst [vmem:[%s790_s27] sm:$0xff] %v296_v26  ;;  %v319_v29 = vsub.f32 0.0, %v317_v27 }
 0x118   : > { %v318_v30 = vsub.f32 0.0, %v316_v28 }
 0x119   : > { %v322_v31 = vmul.f32 1.442695, %v319_v29 }
 0x11a   : > { %v320_v32 = vmul.f32 1.442695, %v318_v30 }
 0x11b   : > { %560 = vpow2.f32 %v322_v31 }
 0x11c   : > { %562 = vpow2.f32 %v320_v32 }
 0x11d   : > { %v394_v58 = vld [vmem:[%s790_s27 + $0x8] sm:$0xff] (%p827_p7) }
 0x11e   : > { %v392_v57 = vld [vmem:[%s790_s27] sm:$0xff] (%p827_p7)  ;;  %395 = vst [vmem:[%s358_s8 + $0x10] sm:$0xff] (%p827_p7), %v394_v58 }
 0x11f   : > { %393 = vst [vmem:[%s358_s8] sm:$0xff] (%p827_p7), %v392_v57 }
 0x125   : > { %v561_v33 = vpop.eup %560 }
 0x126   : > { %v563_v34 = vpop.eup %562  ;;  %v333_v35 = vadd.f32 1.0, %v561_v33  ;;  %v336_v37 = vmul.f32 -0.5, %v561_v33  ;;  %v339_v40 = vand.u32 2147483647, %v561_v33 }
 0x127   : > { %v324_v36 = vadd.f32 1.0, %v563_v34  ;;  %v327_v38 = vmul.f32 -0.5, %v563_v34  ;;  %v330_v42 = vand.u32 2147483647, %v563_v34 }
 0x128   : > { %564 = vlog2.f32 %v333_v35  ;;  %v337_v39 = vadd.f32 1.0, %v336_v37  ;;  %vm340_vm1 = vcmp.lt.f32.partialorder %v339_v40, 0.0004427343 }
 0x129   : > { %566 = vlog2.f32 %v324_v36  ;;  %v328_v41 = vadd.f32 1.0, %v327_v38  ;;  %vm331_vm2 = vcmp.lt.f32.partialorder %v330_v42, 0.0004427343 }
 0x12a   : > { %v338_v46 = vmul.f32 %v561_v33, %v337_v39 }
 0x12b   : > { %v329_v49 = vmul.f32 %v563_v34, %v328_v41 }
 0x132   : > { %v565_v43 = vpop.eup %564 }
 0x133   : > { %v567_v44 = vpop.eup %566  ;;  %v335_v45 = vmul.f32 0.6931472, %v565_v43 }
 0x134   : > { %v326_v48 = vmul.f32 0.6931472, %v567_v44 }
 0x135   : > { %v341_v50 = vsel %vm340_vm1, %v338_v46, %v335_v45  ;;  %356 = sbr.rel (!%p827_p7) target bundleno = 324 (0x144), region = 40 }
 0x136   : > { %v343_v52 = vadd.f32 %v341_v50, %v315_v47  ;;  %v332_v53 = vsel %vm331_vm2, %v329_v49, %v326_v48 }
 0x137   : > { %v342_v54 = vadd.f32 %v332_v53, %v314_v51 }
 0x138   : > { %v345_v55 = vadd.f32 1e-06, %v343_v52 }
 0x139   : > { %v344_v56 = vadd.f32 1e-06, %v342_v54 }
 0x13a   : > { %349 = vst [vmem:[%s790_s27 + $0x18] sm:$0xff] %v345_v55 }
 0x13b   : > { %348 = vst [vmem:[%s790_s27 + $0x10] sm:$0xff] %v344_v56 }
 0x141   : > { %v398_v60 = vld [vmem:[%s790_s27 + $0x18] sm:$0xff] }
 0x142   : > { %v396_v59 = vld [vmem:[%s790_s27 + $0x10] sm:$0xff]  ;;  %399 = vst [vmem:[%s358_s8 + $0x30] sm:$0xff] %v398_v60 }
 0x143   : > { %397 = vst [vmem:[%s358_s8 + $0x20] sm:$0xff] %v396_v59 }
 0x144 PF: > { %p13_p9 = scmp.ge.s32.totalorder %s681_s17, 4   ;;  %s828_s12 = smov %s624_s13 }
 0x145   : > { %s829_s13 = smov %s628_s14  ;;  %s830_s14 = smov %s691_s20 }
 0x146   : > { %s831_s15 = smov %s681_s17  ;;  %15 = sbr.rel (!%p13_p9) target bundleno = 3 (0x3), region = 110 }
 0x14d   :  { %415 = vsyncpa [#allocation3], 1 }
 0x14e   :  { %417 = vsyncpa [#allocation3 + $0x1], 1 }

</bundles_post_ra>
